<compile_context>
chip_gen: v5e
topology: v5e:2x2
jax: 0.10.0
libtpu: 0.0.40
codegen_flags: <defaults>
</compile_context>

<pallas_src>
import functools

import jax
import jax.numpy as jnp
from jax.experimental import pallas as pl
from jax.experimental.pallas import tpu as pltpu

STATE_DIM = 16
ACTION_DIM = 8
IN_DIM = STATE_DIM + ACTION_DIM   # fused layer-1 input width (concat of state/action)
H1 = 32                           # hidden of each input net (fused width = 2*H1)
H2 = 32                           # hidden of the output net
OUT = 1                           # Q value
LEAKY_SLOPE = 0.01                # nn.LeakyReLU() default negative_slope


def _leaky_relu(x):
    return jnp.where(x >= 0, x, LEAKY_SLOPE * x)


def _round_up(x, m):
    return (x + m - 1) // m * m


def critic_kernel(x_ref, w1_ref, b1_ref, w2_ref, b2_ref, w3_ref, b3_ref, q_ref):
    # layer 1: block-diagonal fused matmul == [state-net ; action-net] Linears
    h1 = jnp.dot(x_ref[...], w1_ref[...], preferred_element_type=jnp.float32)
    h1 = _leaky_relu(h1 + b1_ref[...])

    # layer 2: Linear on concat(hs, ha) — single K=64 matmul
    h2 = jnp.dot(h1.astype(jnp.bfloat16), w2_ref[...],
                 preferred_element_type=jnp.float32)
    h2 = _leaky_relu(h2 + b2_ref[...])

    # layer 3 (out_features == 1): broadcast-multiply + lane reduction instead
    # of an N=1 MXU matmul; b3 is a scalar living in SMEM.
    q = jnp.sum(h2 * w3_ref[...], axis=-1, keepdims=True) + b3_ref[0, 0]
    q_ref[...] = q.astype(q_ref.dtype)


@functools.partial(jax.jit, static_argnames=("tile_b",))
def critic_forward(state, action, params, tile_b=2048):
    """state: [B, 16] f32, action: [B, 8] f32 -> Q: [B, 1] f32."""
    w1, b1, w2, b2, w3_row, b3 = params
    B = state.shape[0]

    # Fuse the two input streams into one lane-dense [B, 24] bf16 stream.
    x = jnp.concatenate([state, action], axis=1).astype(jnp.bfloat16)

    # Batch tile: big enough to amortize per-step overhead, clamped (and padded)
    # for small batches.  Multiple of 16 so bf16 sublane packing is happy.
    tb = min(tile_b, _round_up(B, 16))
    b_pad = _round_up(B, tb)
    if b_pad != B:
        x = jnp.pad(x, ((0, b_pad - B), (0, 0)))
    grid = (b_pad // tb,)

    const = lambda i: (0, 0)   # params: constant block index -> VMEM-resident
    q = pl.pallas_call(
        critic_kernel,
        out_shape=jax.ShapeDtypeStruct((b_pad, OUT), jnp.float32),
        grid=grid,
        in_specs=[
            pl.BlockSpec((tb, IN_DIM), lambda i: (i, 0)),       # x tile (streamed)
            pl.BlockSpec((IN_DIM, 2 * H1), const),              # W1 (block-diag, bf16)
            pl.BlockSpec((1, 2 * H1), const),                   # b1 (f32)
            pl.BlockSpec((2 * H1, H2), const),                  # W2 (bf16)
            pl.BlockSpec((1, H2), const),                       # b2 (f32)
            pl.BlockSpec((1, H2), const),                       # w3 row (f32)
            pl.BlockSpec((1, 1), const,
                         memory_space=pltpu.MemorySpace.SMEM),  # b3 scalar
        ],
        out_specs=pl.BlockSpec((tb, OUT), lambda i: (i, 0)),
        compiler_params=pltpu.CompilerParams(
            dimension_semantics=("parallel",)),
    )(x, w1, b1, w2, b2, w3_row, b3)
    return q[:B]


# ----------------------- parameter construction -----------------------------

def fanin_init(key, shape_out_in):
    # replicate fanin_init: fanin = size[0] (= out_features for nn.Linear weight)
    out_f, in_f = shape_out_in
    v = 1.0 / jnp.sqrt(jnp.float32(out_f))
    w = jax.random.uniform(key, (out_f, in_f), jnp.float32, -v, v)
    return w.T  # store as [in, out] for x @ W


def uniform_init(key, shape_out_in, w=0.003):
    out_f, in_f = shape_out_in
    return jax.random.uniform(key, (out_f, in_f), jnp.float32, -w, w).T


def bias_init(key, in_f, out_f):
    # nn.Linear default bias init: U(-1/sqrt(in_features), 1/sqrt(in_features))
    v = 1.0 / jnp.sqrt(jnp.float32(in_f))
    return jax.random.uniform(key, (1, out_f), jnp.float32, -v, v)


def make_params(key):
    ks = jax.random.split(key, 8)
    w1s = fanin_init(ks[0], (H1, STATE_DIM))          # [16, 32]
    b1s = bias_init(ks[1], STATE_DIM, H1)             # [1, 32]
    w1a = fanin_init(ks[2], (H1, ACTION_DIM))         # [8, 32]
    b1a = bias_init(ks[3], ACTION_DIM, H1)            # [1, 32]
    w2 = fanin_init(ks[4], (H2, 2 * H1))              # [64, 32]
    b2 = bias_init(ks[5], 2 * H1, H2)                 # [1, 32]
    w3 = uniform_init(ks[6], (OUT, H2))               # [32, 1]
    b3 = bias_init(ks[7], H2, OUT)                    # [1, 1]

    # Fuse the two input nets into one block-diagonal W1: concat(state, action)
    # @ W1 == [state @ w1s, action @ w1a].
    w1 = jnp.zeros((IN_DIM, 2 * H1), jnp.float32)
    w1 = w1.at[:STATE_DIM, :H1].set(w1s).at[STATE_DIM:, H1:].set(w1a)
    b1 = jnp.concatenate([b1s, b1a], axis=1)          # [1, 64]
    w3_row = w3.T                                     # [1, 32] for lane reduction

    return (w1.astype(jnp.bfloat16), b1,
            w2.astype(jnp.bfloat16), b2,
            w3_row, b3)


# --------------------------- pure-JAX reference ------------------------------

def critic_reference(state, action, params):
    w1, b1, w2, b2, w3_row, b3 = params
    x = jnp.concatenate([state, action], axis=1).astype(jnp.bfloat16)
    h1 = _leaky_relu(jnp.dot(x, w1, preferred_element_type=jnp.float32) + b1)
    h2 = _leaky_relu(jnp.dot(h1.astype(jnp.bfloat16), w2,
                             preferred_element_type=jnp.float32) + b2)
    return jnp.sum(h2 * w3_row, axis=-1, keepdims=True) + b3


if __name__ == "__main__":
    key = jax.random.PRNGKey(0)
    k_s, k_a, k_p = jax.random.split(key, 3)
    params = make_params(k_p)

    # Small shapes consistent with the module.
    batch = 2
    state = jax.random.normal(k_s, (batch, STATE_DIM), jnp.float32)
    action = jax.random.normal(k_a, (batch, ACTION_DIM), jnp.float32)

    q = jax.block_until_ready(critic_forward(state, action, params))
    q_ref = critic_reference(state, action, params)
    assert q.shape == (batch, OUT)
    assert jnp.allclose(q, q_ref, atol=1e-4, rtol=1e-4)

    # Also exercise the multi-step batch grid (padding + pipelined tiles).
    batch2 = 1037
    k_s2, k_a2 = jax.random.split(jax.random.PRNGKey(1))
    state2 = jax.random.normal(k_s2, (batch2, STATE_DIM), jnp.float32)
    action2 = jax.random.normal(k_a2, (batch2, ACTION_DIM), jnp.float32)
    q2 = jax.block_until_ready(critic_forward(state2, action2, params, tile_b=512))
    q2_ref = critic_reference(state2, action2, params)
    assert q2.shape == (batch2, OUT)
    assert jnp.allclose(q2, q2_ref, atol=1e-4, rtol=1e-4)

    print("KERNEL_OK")
</pallas_src>

<mosaic_0001>
module attributes {stable_mosaic.version = 11 : i64} {
  func.func @critic_kernel(%arg0: i32, %arg1: memref<16x24xbf16, #tpu.memory_space<vmem>>, %arg2: memref<24x64xbf16, #tpu.memory_space<vmem>>, %arg3: memref<1x64xf32, #tpu.memory_space<vmem>>, %arg4: memref<64x32xbf16, #tpu.memory_space<vmem>>, %arg5: memref<1x32xf32, #tpu.memory_space<vmem>>, %arg6: memref<1x32xf32, #tpu.memory_space<vmem>>, %arg7: memref<1x1xf32, #tpu.memory_space<smem>>, %arg8: memref<16x1xf32, #tpu.memory_space<vmem>>) attributes {dimension_semantics = [#tpu.dimension_semantics<parallel>], iteration_bounds = array<i64: 1>, scalar_prefetch = 0 : i64, scratch_operands = 0 : i64, tpu.core_type = #tpu.core_type<tc>, window_params = [{transform_indices = @transform_0, window_bounds = array<i64: 16, 24>}, {pipeline_mode = #tpu.pipeline_mode<synchronous>, transform_indices = @transform_1, window_bounds = array<i64: 24, 64>}, {pipeline_mode = #tpu.pipeline_mode<synchronous>, transform_indices = @transform_2, window_bounds = array<i64: 1, 64>}, {pipeline_mode = #tpu.pipeline_mode<synchronous>, transform_indices = @transform_3, window_bounds = array<i64: 64, 32>}, {pipeline_mode = #tpu.pipeline_mode<synchronous>, transform_indices = @transform_4, window_bounds = array<i64: 1, 32>}, {pipeline_mode = #tpu.pipeline_mode<synchronous>, transform_indices = @transform_5, window_bounds = array<i64: 1, 32>}, {transform_indices = @transform_6, window_bounds = array<i64: 1, 1>}, {transform_indices = @transform_7, window_bounds = array<i64: 16, 1>}]} {
    %c0 = arith.constant 0 : index
    %c0_0 = arith.constant 0 : index
    %0 = vector.load %arg1[%c0, %c0_0] : memref<16x24xbf16, #tpu.memory_space<vmem>>, vector<16x24xbf16>
    %c0_1 = arith.constant 0 : index
    %c0_2 = arith.constant 0 : index
    %1 = vector.load %arg2[%c0_1, %c0_2] : memref<24x64xbf16, #tpu.memory_space<vmem>>, vector<24x64xbf16>
    %cst = arith.constant dense<0.000000e+00> : vector<16x64xf32>
    %2 = tpu.matmul %0, %1, %cst {dimension_numbers = #tpu.dot_dimension_numbers<[1], [0], [0], [1], [0, 0, 1, 1], [], []>} : vector<16x24xbf16>, vector<24x64xbf16>, vector<16x64xf32> -> vector<16x64xf32>
    %c0_3 = arith.constant 0 : index
    %c0_4 = arith.constant 0 : index
    %3 = vector.load %arg3[%c0_3, %c0_4] : memref<1x64xf32, #tpu.memory_space<vmem>>, vector<1x64xf32>
    %4 = vector.broadcast %3 : vector<1x64xf32> to vector<16x64xf32>
    %5 = arith.addf %2, %4 : vector<16x64xf32>
    %cst_5 = arith.constant 0.000000e+00 : f32
    %6 = vector.broadcast %cst_5 : f32 to vector<16x64xf32>
    %7 = arith.cmpf oge, %5, %6 : vector<16x64xf32>
    %cst_6 = arith.constant 0.00999999977 : f32
    %8 = vector.broadcast %cst_6 : f32 to vector<16x64xf32>
    %9 = arith.mulf %8, %5 : vector<16x64xf32>
    %10 = arith.select %7, %5, %9 : vector<16x64xi1>, vector<16x64xf32>
    %11 = arith.truncf %10 : vector<16x64xf32> to vector<16x64xbf16>
    %c0_7 = arith.constant 0 : index
    %c0_8 = arith.constant 0 : index
    %12 = vector.load %arg4[%c0_7, %c0_8] : memref<64x32xbf16, #tpu.memory_space<vmem>>, vector<64x32xbf16>
    %cst_9 = arith.constant dense<0.000000e+00> : vector<16x32xf32>
    %13 = tpu.matmul %11, %12, %cst_9 {dimension_numbers = #tpu.dot_dimension_numbers<[1], [0], [0], [1], [0, 0, 1, 1], [], []>} : vector<16x64xbf16>, vector<64x32xbf16>, vector<16x32xf32> -> vector<16x32xf32>
    %c0_10 = arith.constant 0 : index
    %c0_11 = arith.constant 0 : index
    %14 = vector.load %arg5[%c0_10, %c0_11] : memref<1x32xf32, #tpu.memory_space<vmem>>, vector<1x32xf32>
    %15 = vector.broadcast %14 : vector<1x32xf32> to vector<16x32xf32>
    %16 = arith.addf %13, %15 : vector<16x32xf32>
    %cst_12 = arith.constant 0.000000e+00 : f32
    %17 = vector.broadcast %cst_12 : f32 to vector<16x32xf32>
    %18 = arith.cmpf oge, %16, %17 : vector<16x32xf32>
    %cst_13 = arith.constant 0.00999999977 : f32
    %19 = vector.broadcast %cst_13 : f32 to vector<16x32xf32>
    %20 = arith.mulf %19, %16 : vector<16x32xf32>
    %21 = arith.select %18, %16, %20 : vector<16x32xi1>, vector<16x32xf32>
    %c0_14 = arith.constant 0 : index
    %c0_15 = arith.constant 0 : index
    %22 = vector.load %arg6[%c0_14, %c0_15] : memref<1x32xf32, #tpu.memory_space<vmem>>, vector<1x32xf32>
    %23 = vector.broadcast %22 : vector<1x32xf32> to vector<16x32xf32>
    %24 = arith.mulf %21, %23 : vector<16x32xf32>
    %cst_16 = arith.constant dense<0.000000e+00> : vector<16xf32>
    %25 = vector.multi_reduction <add>, %24, %cst_16 [1] : vector<16x32xf32> to vector<16xf32>
    %26 = vector.shape_cast %25 : vector<16xf32> to vector<16x1xf32>
    %c0_17 = arith.constant 0 : index
    %c0_18 = arith.constant 0 : index
    %27 = memref.load %arg7[%c0_17, %c0_18] : memref<1x1xf32, #tpu.memory_space<smem>>
    %28 = vector.broadcast %27 : f32 to vector<16x1xf32>
    %29 = arith.addf %26, %28 : vector<16x1xf32>
    %c0_19 = arith.constant 0 : index
    %c0_20 = arith.constant 0 : index
    %30 = vector.load %arg8[%c0_19, %c0_20] : memref<16x1xf32, #tpu.memory_space<vmem>>, vector<16x1xf32>
    tpu.vector_store %arg8[%c0_19, %c0_20], %29 {strides = array<i32>} : memref<16x1xf32, #tpu.memory_space<vmem>>, vector<16x1xf32>,
    return
  }
  func.func @transform_0(%arg0: i32) -> (i32, i32) {
    %c0_i32 = arith.constant 0 : i32
    %c0_i32_0 = arith.constant 0 : i32
    return %arg0, %c0_i32 : i32, i32
  }
  func.func @transform_1(%arg0: i32) -> (i32, i32) {
    %c0_i32 = arith.constant 0 : i32
    %c0_i32_0 = arith.constant 0 : i32
    %c0_i32_1 = arith.constant 0 : i32
    return %c0_i32, %c0_i32_0 : i32, i32
  }
  func.func @transform_2(%arg0: i32) -> (i32, i32) {
    %c0_i32 = arith.constant 0 : i32
    %c0_i32_0 = arith.constant 0 : i32
    %c0_i32_1 = arith.constant 0 : i32
    return %c0_i32, %c0_i32_0 : i32, i32
  }
  func.func @transform_3(%arg0: i32) -> (i32, i32) {
    %c0_i32 = arith.constant 0 : i32
    %c0_i32_0 = arith.constant 0 : i32
    %c0_i32_1 = arith.constant 0 : i32
    return %c0_i32, %c0_i32_0 : i32, i32
  }
  func.func @transform_4(%arg0: i32) -> (i32, i32) {
    %c0_i32 = arith.constant 0 : i32
    %c0_i32_0 = arith.constant 0 : i32
    %c0_i32_1 = arith.constant 0 : i32
    return %c0_i32, %c0_i32_0 : i32, i32
  }
  func.func @transform_5(%arg0: i32) -> (i32, i32) {
    %c0_i32 = arith.constant 0 : i32
    %c0_i32_0 = arith.constant 0 : i32
    %c0_i32_1 = arith.constant 0 : i32
    return %c0_i32, %c0_i32_0 : i32, i32
  }
  func.func @transform_6(%arg0: i32) -> (i32, i32) {
    %c0_i32 = arith.constant 0 : i32
    %c0_i32_0 = arith.constant 0 : i32
    %c0_i32_1 = arith.constant 0 : i32
    return %c0_i32, %c0_i32_0 : i32, i32
  }
  func.func @transform_7(%arg0: i32) -> (i32, i32) {
    %c0_i32 = arith.constant 0 : i32
    %c0_i32_0 = arith.constant 0 : i32
    return %arg0, %c0_i32 : i32, i32
  }
}

</mosaic_0001>

<bundles_post_ra>
// kernel: critic_forward.1
= control target key start
LH: loop header
LB: loop body
LE: loop exit
PB: predicated region body
PF: predicated region fallthrough
CT: control target
= control target key end

     0   :  { %vm55_vm0 = vcmask 1043456   ;;  %vm51_vm1 = vcmask 195584   ;;  %vm116_vm4 = vcmask 523264   ;;  %vm146_vm6 = vcmask 261120   ;;  %s278_s1 = inlined_call_operand.vmem [shape: bf16[24,64], index: 1, kind: input, shape index: {}]   ;;  %s279_s2 = inlined_call_operand.vmem [shape: f32[1,64], index: 2, kind: input, shape index: {}]   ;;  %s280_s0 = inlined_call_operand.vmem [shape: bf16[16,24], index: 0, kind: input, shape index: {}]   ;;  %s281_s4 = inlined_call_operand.vmem [shape: f32[1,32], index: 4, kind: input, shape index: {}]   ;;  %s282_s3 = inlined_call_operand.vmem [shape: bf16[64,32], index: 3, kind: input, shape index: {}]   ;;  %s283_s5 = inlined_call_operand.vmem [shape: f32[1,32], index: 5, kind: input, shape index: {}]   ;;  %s284_s6 = inlined_call_operand.<no memory space> [shape: f32[1,1], index: 6, kind: input, shape index: {}]   ;;  %s285_s7 = inlined_call_operand.vmem [shape: f32[16,1], index: 7, kind: output, shape index: {}]  }
   0x1   :  { %v32_v0 = vld [vmem:[%s278_s1 + $0x8] sm:$0xf]  ;;  %v191_v4 = vld [vmem:[%s278_s1] sm:$0xff]  ;;  %v195_v6 = vld [vmem:[%s282_s3 + $0x18] sm:$0xff]  ;;  %v154_v34 = vstv %s284_s6  ;;  %vm157_vm8 = vcmask 7168  }
   0x2   :  { %v47_v1 = vunpack.c.l.b16 %v32_v0  ;;  %v190_v5 = vld [vmem:[%s280_s0] sm:$0xff]  ;;  %124 = vmatpush.bf16.msra.mxu1 %v195_v6  ;;  %v194_v7 = vld [vmem:[%s282_s3 + $0x10] sm:$0xff]  ;;  %v193_v8 = vld [vmem:[%s282_s3 + $0x8] sm:$0xff] }
   0x3   :  { %v192_v9 = vld [vmem:[%s282_s3] sm:$0xff] }
   0x4   :  { %v49_v2 = vpack.c.b16 %v47_v1, %v47_v1  ;;  %v196_v11 = vld [vmem:[%s279_s2] ss:$0 sm:$0xff] }
   0x5   :  { %v197_v20 = vld [vmem:[%s281_s4] ss:$0 sm:$0xff] }
   0x6   :  { %v57_v3 = vsel %vm55_vm0, %v49_v2, 0  ;;  %125 = vmatpush.bf16.msra.mxu1 %v194_v7  ;;  %v198_v23 = vld [vmem:[%s283_s5] ss:$0 sm:$0xff] }
   0x7   :  { %65 = vmatpush.bf16.msra.mxu0 %v57_v3 }
   0xa   :  { %126 = vmatpush.bf16.msra.mxu1 %v193_v8 }
   0xb   :  { %66 = vmatpush.bf16.msra.mxu0 %v191_v4 }
   0xe   :  { %172 = vmatmul.msk.bf16.vlgmr.msra.gmra.mxu0 %vm51_vm1, %v190_v5  ;;  %127 = vmatpush.bf16.msra.mxu1 %v192_v9 }
  0x8b   :  { %v68_v10 = vpop.f32.mrf.mxu0 }
  0x8c   :  { %v69_v12 = vadd.f32 %v196_v11, %v68_v10 }
  0x8e   :  { %v75_v14 = vmul.f32 0.01, %v69_v12  ;;  %vm73_vm2 = vcmp.ge.f32.partialorder %v69_v12, 0.0 }
  0x90   :  { %v77_v17 = vsel %vm73_vm2, %v69_v12, %v75_v14 }
  0x93   :  { %v70_v13 = vpop.f32.mrf.mxu0 }
  0x94   :  { %v71_v15 = vadd.f32 %v196_v11, %v70_v13 }
  0x96   :  { %vm74_vm3 = vcmp.ge.f32.partialorder %v71_v15, 0.0  ;;  %v76_v16 = vmul.f32 0.01, %v71_v15 }
  0x98   :  { %v78_v18 = vsel %vm74_vm3, %v71_v15, %v76_v16 }
  0x99   :  { %v79_v19 = vpack.c.bf16 %v78_v18, %v77_v17 }
  0x9b   :  { %189 = vmatmul.msk.bf16.vlgmr.msra.gmra.mxu1 %vm116_vm4, %v79_v19 }
 0x118   :  { %v129_v21 = vpop.f32.mrf.mxu1 }
 0x119   :  { %v130_v22 = vadd.f32 %v197_v20, %v129_v21 }
 0x11b   :  { %v136_v24 = vmul.f32 0.01, %v130_v22  ;;  %vm134_vm5 = vcmp.ge.f32.partialorder %v130_v22, 0.0 }
 0x11d   :  { %v138_v25 = vsel %vm134_vm5, %v130_v22, %v136_v24 }
 0x11e   :  { %v144_v26 = vmul.f32 %v198_v23, %v138_v25 }
 0x120   :  { %v131_v27 = vpop.f32.mrf.mxu1  ;;  %v147_v28 = vsel %vm146_vm6, %v144_v26, 0.0 }
 0x121   :  { %v132_v29 = vadd.f32 %v197_v20, %v131_v27  ;;  %148 = vadd.xlane.f32.xlu0 %v147_v28 }
 0x123   :  { %vm135_vm7 = vcmp.ge.f32.partialorder %v132_v29, 0.0  ;;  %v137_v30 = vmul.f32 0.01, %v132_v29 }
 0x125   :  { %v139_v31 = vsel %vm135_vm7, %v132_v29, %v137_v30 }
 0x126   :  { %v145_v32 = vmul.f32 %v198_v23, %v139_v31 }
 0x128   :  { %v150_v33 = vsel %vm146_vm6, %v145_v32, 0.0 }
 0x129   :  { %151 = vadd.xlane.f32.xlu0 %v150_v33 }
 0x194   :  { %v149_v35 = vpop.xlane.xlu0 %148 }
 0x195   :  { %v155_v36 = vadd.f32 %v154_v34, %v149_v35 }
 0x197   :  { %158 = vst.msk [vmem:[%s285_s7] sm:$0xff] %vm157_vm8, %v155_v36 }
 0x19c   :  { %v152_v37 = vpop.xlane.xlu0 %151 }
 0x19d   :  { %v156_v38 = vadd.f32 %v154_v34, %v152_v37 }
 0x19f   :  { %159 = vst.msk [vmem:[%s285_s7 + $0x8] sm:$0xff] %vm157_vm8, %v156_v38 }

</bundles_post_ra>
